<compile_context>
chip_gen: v7x
topology: tpu7x:2x2x1
jax: 0.10.0
libtpu: 0.0.40
codegen_flags: <defaults>
</compile_context>

<pallas_src>
import functools

import jax
import jax.numpy as jnp
from jax import lax
from jax.experimental import pallas as pl
from jax.experimental.pallas import tpu as pltpu


def physics_engine_kernel(xT_ref,
                          w1_ref, b1_ref,
                          w2_ref, b2_ref,
                          w3_ref, b3_ref,
                          w4t_ref, b4_ref,
                          o_ref,
                          *, out_via_mxu: bool):
    """Fused 4-layer MLP in transposed (feature-major, batch-on-lanes) layout.

    xT_ref  : [in_dim, block_b]  f32   (batch on the 128-wide lane axis)
    w1_ref  : [hidden, in_dim]   f32,  b1_ref: [hidden, 1] f32
    w2/w3   : [hidden, hidden]   f32 or bf16 (pre-cast once in the wrapper)
    b2/b3   : [hidden, 1]        matching dtype
    w4t_ref : [hidden, out_dim]  f32,  b4_ref: [out_dim, 1] f32
    o_ref   : [out_dim, block_b] f32   (lane-dense, unmasked store)

    NOTE (ragged last batch block): padded columns of xT hold undefined data.
    Every op here is per-batch-column and the OOB output columns are masked by
    Pallas, so this is safe — do NOT add a cross-batch reduction (norm/loss)
    inside this kernel without masking those columns first.
    """
    xT = xT_ref[...]                                   # [in_dim, Bt] f32
    in_dim = xT_ref.shape[0]
    w1 = w1_ref[...]                                   # [hidden, in_dim] f32

    # ---- layer 1: K == in_dim is tiny -> VPU broadcast FMAs, skip the MXU ----
    if in_dim <= 8:
        h = w1[:, 0:1] * xT[0:1, :]                    # [hidden, Bt]
        for k in range(1, in_dim):
            h = h + w1[:, k:k + 1] * xT[k:k + 1, :]
        h = h + b1_ref[...]
    else:
        h = jnp.dot(w1, xT, preferred_element_type=jnp.float32) + b1_ref[...]
    h = jnp.maximum(h, 0.0)

    # ---- layers 2 & 3: lane-dense MXU matmuls ----
    # Compute dtype follows the (wrapper-pre-cast, grid-invariant) weight dtype:
    # bf16 on v6e/v7x cuts MXU pass count ~3x vs f32-emulated matmul; bias+ReLU and
    # the inter-layer activation stay bf16 (one cast after the layer-1 ReLU).
    compute_dtype = w2_ref.dtype
    h = h.astype(compute_dtype)

    def hidden_layer(w_ref, b_ref, h):
        hh = jnp.dot(w_ref[...], h, preferred_element_type=compute_dtype)
        return jnp.maximum(hh + b_ref[...], 0)

    h = hidden_layer(w2_ref, b2_ref, h)
    h = hidden_layer(w3_ref, b3_ref, h)
    # TODO(synk): if bundle dumps show vmatmul/vpop as the critical slot on v6e/v7x,
    # block-diagonal-pack 4 batch column groups ([64,Bt] -> [256,Bt/4]) with
    # replicated [256,256] weights to fill the 256-wide MXU (skip on v5e).

    # ---- layer 4: out_dim == 1 -> VPU mul + f32 feature reduction (MXU idle here) ----
    w4t = w4t_ref[...]                                 # [hidden, out_dim] f32
    if out_via_mxu or w4t.shape[1] != 1:
        y = lax.dot_general(w4t.astype(h.dtype), h, (((0,), (0,)), ((), ())),
                            preferred_element_type=jnp.float32) + b4_ref[...]
    else:
        # f32 * bf16 promotes to f32, so the reduction accumulates in f32.
        y = jnp.sum(w4t * h, axis=0, keepdims=True) + b4_ref[...]

    o_ref[...] = y.astype(o_ref.dtype)                 # lane-dense store


def _as_col(b):
    b = jnp.asarray(b, jnp.float32)
    # Accepts PyTorch-checkpoint-style [out]-shaped biases as well as [out, 1].
    return b.reshape(-1, 1) if b.ndim == 1 else b


def _default_mxu_bf16():
    """bf16 MXU operands by default on chips with a bf16 VPU (v6e / v7x).

    Kept off on v5e (no bf16 VALU: per-layer converts are relatively pricier —
    benchmark before enabling there) and on unknown / non-TPU backends.
    """
    try:
        kind = jax.devices()[0].device_kind.lower()
    except Exception:
        return False
    return any(g in kind for g in ("v6", "v7", "tpu7"))


def _choose_block_b(B, max_block_b):
    """Batch tile: whole batch when tiny; otherwise a 128-multiple giving >= 2 grid
    steps (both v7x TensorCores get work), capped so per-step overhead is amortized."""
    if B < 256:
        return B
    half = max((B // 2) // 128 * 128, 128)
    return min(half, max_block_b)


def physics_engine_forward(x, params, *, block_b=None, max_block_b=4096,
                           mxu_bf16=None, input_feature_major=False,
                           feature_major_output=False, out_via_mxu=False):
    """Forward pass matching the PyTorch nn.Sequential module.

    x      : [B, input_size] f32 (or [input_size, B] if input_feature_major=True).
    params : ((w1,b1),(w2,b2),(w3,b3),(w4,b4)), weights in PyTorch [out, in] layout,
             biases [out] or [out, 1].
    Returns [B, output_size] f32 (or [output_size, B] if feature_major_output=True).
    """
    (w1, b1), (w2, b2), (w3, b3), (w4, b4) = params
    w1, w2, w3, w4 = (jnp.asarray(w, jnp.float32) for w in (w1, w2, w3, w4))
    b1, b2, b3, b4 = (_as_col(b) for b in (b1, b2, b3, b4))

    if input_feature_major:
        in_dim, B = x.shape
        xT = x
    else:
        B, in_dim = x.shape
        # TODO(synk): have the producer emit x feature-major (or fuse this transpose
        # into x's producer) to drop this extra XLA relayout copy.
        xT = x.T
    out_dim = w4.shape[0]
    assert w1.shape[1] == in_dim

    if mxu_bf16 is None:
        mxu_bf16 = _default_mxu_bf16()

    # Hoist the MXU-operand casts out of the grid body: the weights/biases are
    # grid-invariant and resident in VMEM, so cast them once here, not per step.
    if mxu_bf16:
        w2c, b2c = w2.astype(jnp.bfloat16), b2.astype(jnp.bfloat16)
        w3c, b3c = w3.astype(jnp.bfloat16), b3.astype(jnp.bfloat16)
    else:
        w2c, b2c, w3c, b3c = w2, b2, w3, b3
    w4t = w4.T                                          # [hidden, out_dim]

    if block_b is None:
        block_b = _choose_block_b(B, max_block_b)
    if block_b != B:
        assert block_b % 128 == 0, "tiled block_b must be a multiple of 128 (lane axis)"
    grid = (pl.cdiv(B, block_b),)

    # Grid-invariant full-array blocks for the tiny weights/biases (never re-fetched).
    def full(a):
        return pl.BlockSpec(a.shape, lambda i, _nd=a.ndim: (0,) * _nd)

    flops = 2 * int(B) * sum(int(w.shape[0]) * int(w.shape[1]) for w in (w1, w2, w3, w4))
    bytes_accessed = int(
        xT.size * xT.dtype.itemsize + B * out_dim * 4
        + sum(int(a.size) * a.dtype.itemsize
              for a in (w1, b1, w2c, b2c, w3c, b3c, w4t, b4)))

    kernel = functools.partial(physics_engine_kernel, out_via_mxu=out_via_mxu)

    out_t = pl.pallas_call(
        kernel,
        out_shape=jax.ShapeDtypeStruct((out_dim, B), jnp.float32),
        grid_spec=pltpu.PrefetchScalarGridSpec(
            num_scalar_prefetch=0,
            grid=grid,
            in_specs=[
                pl.BlockSpec((in_dim, block_b), lambda i: (0, i)),
                full(w1), full(b1),
                full(w2c), full(b2c),
                full(w3c), full(b3c),
                full(w4t), full(b4),
            ],
            out_specs=pl.BlockSpec((out_dim, block_b), lambda i: (0, i)),
        ),
        compiler_params=pltpu.CompilerParams(dimension_semantics=("parallel",)),
        cost_estimate=pl.CostEstimate(flops=flops, transcendentals=0,
                                      bytes_accessed=bytes_accessed),
    )(xT, w1, b1, w2c, b2c, w3c, b3c, w4t, b4)

    if feature_major_output:
        return out_t                                    # [out_dim, B]
    return out_t.T                                      # [B, out_dim]; free reshape when out_dim == 1


def init_params(key, input_size=2, hidden_size=64, output_size=1):
    """Deterministic init mirroring nn.Linear (weights [out, in], biases [out, 1])."""
    dims = [(input_size, hidden_size),
            (hidden_size, hidden_size),
            (hidden_size, hidden_size),
            (hidden_size, output_size)]
    params = []
    for fan_in, fan_out in dims:
        key, kw, kb = jax.random.split(key, 3)
        bound = 1.0 / jnp.sqrt(fan_in)                  # torch.nn.Linear default range
        w = jax.random.uniform(kw, (fan_out, fan_in), jnp.float32, -bound, bound)
        b = jax.random.uniform(kb, (fan_out, 1), jnp.float32, -bound, bound)
        params.append((w, b))
    return params


def reference_forward(x, params, *, mxu_bf16=False):
    """Pure-JAX reference in standard [batch, features] layout."""
    n = len(params)
    h = jnp.asarray(x, jnp.float32)
    for i, (w, b) in enumerate(params):
        b_row = jnp.reshape(b, (1, -1))
        if mxu_bf16 and 0 < i < n - 1:
            hh = jnp.dot(h.astype(jnp.bfloat16), w.T.astype(jnp.bfloat16),
                         preferred_element_type=jnp.bfloat16)
            h = jnp.maximum(hh + b_row.astype(jnp.bfloat16), 0)
        else:
            h = jnp.dot(h.astype(jnp.float32), w.T,
                        preferred_element_type=jnp.float32) + b_row
            if i < n - 1:
                h = jnp.maximum(h, 0.0)
    return h


# TODO(synk): for the production B~8 per-physics-step path, the right fix is at the
# call site: stack many environments / timesteps onto the batch (lane) axis of one
# pallas_call, or keep weights resident across calls with a cross-call prefetch —
# at B=8 the kernel is pure launch + weight-DMA overhead and batching is a 10-100x win.

if __name__ == "__main__":
    key = jax.random.PRNGKey(0)
    key, kx = jax.random.split(key)

    input_size, hidden_size, output_size = 2, 64, 1

    # Small batch, but large enough for a 2-step grid (block_b=256) so tiling,
    # pipelining and the v7x two-TensorCore path are exercised.
    batch = 512
    x = jax.random.normal(kx, (batch, input_size), jnp.float32)
    params = init_params(key, input_size, hidden_size, output_size)

    # 1) exact f32 path (faithful to the PyTorch module's numerics).
    out = jax.block_until_ready(physics_engine_forward(x, params, mxu_bf16=False))
    ref = reference_forward(x, params)
    assert out.shape == (batch, output_size)
    assert jnp.allclose(out, ref, atol=1e-5, rtol=1e-5)

    # 2) default path: bf16 MXU auto-enabled on v6e/v7x, f32 elsewhere.
    auto_bf16 = _default_mxu_bf16()
    out_auto = jax.block_until_ready(physics_engine_forward(x, params))
    ref_auto = reference_forward(x, params, mxu_bf16=auto_bf16)
    tol = 1e-2 if auto_bf16 else 1e-5
    assert jnp.allclose(out_auto, ref_auto, atol=tol, rtol=tol)

    # 3) explicit bf16-MXU path vs a matching bf16 reference.
    out_bf16 = jax.block_until_ready(physics_engine_forward(x, params, mxu_bf16=True))
    ref_bf16 = reference_forward(x, params, mxu_bf16=True)
    assert jnp.allclose(out_bf16, ref_bf16, atol=1e-2, rtol=1e-2)

    # 4) feature-major input + output: skips both wrapper-side relayout copies.
    out_fm = jax.block_until_ready(
        physics_engine_forward(x.T, params, input_feature_major=True,
                               feature_major_output=True, mxu_bf16=False))
    assert out_fm.shape == (output_size, batch)
    assert jnp.allclose(out_fm.T, ref, atol=1e-5, rtol=1e-5)

    # 5) tiny batch (B=8): single full-array block, still correct.
    x_small = jax.random.normal(jax.random.PRNGKey(1), (8, input_size), jnp.float32)
    out_small = jax.block_until_ready(physics_engine_forward(x_small, params, mxu_bf16=False))
    assert jnp.allclose(out_small, reference_forward(x_small, params),
                        atol=1e-5, rtol=1e-5)

    print("KERNEL_OK")
</pallas_src>

<mosaic_0001>
module attributes {stable_mosaic.version = 11 : i64} {
  func.func @physics_engine_kernel(%arg0: i32, %arg1: memref<2x256xf32, #tpu.memory_space<vmem>>, %arg2: memref<64x2xf32, #tpu.memory_space<vmem>>, %arg3: memref<64x1xf32, #tpu.memory_space<vmem>>, %arg4: memref<64x64xf32, #tpu.memory_space<vmem>>, %arg5: memref<64x1xf32, #tpu.memory_space<vmem>>, %arg6: memref<64x64xf32, #tpu.memory_space<vmem>>, %arg7: memref<64x1xf32, #tpu.memory_space<vmem>>, %arg8: memref<64x1xf32, #tpu.memory_space<vmem>>, %arg9: memref<1x1xf32, #tpu.memory_space<vmem>>, %arg10: memref<1x256xf32, #tpu.memory_space<vmem>>) attributes {dimension_semantics = [#tpu.dimension_semantics<parallel>], iteration_bounds = array<i64: 2>, scalar_prefetch = 0 : i64, scratch_operands = 0 : i64, tpu.core_type = #tpu.core_type<tc>, window_params = [{transform_indices = @transform_0, window_bounds = array<i64: 2, 256>}, {pipeline_mode = #tpu.pipeline_mode<synchronous>, transform_indices = @transform_1, window_bounds = array<i64: 64, 2>}, {pipeline_mode = #tpu.pipeline_mode<synchronous>, transform_indices = @transform_2, window_bounds = array<i64: 64, 1>}, {pipeline_mode = #tpu.pipeline_mode<synchronous>, transform_indices = @transform_3, window_bounds = array<i64: 64, 64>}, {pipeline_mode = #tpu.pipeline_mode<synchronous>, transform_indices = @transform_4, window_bounds = array<i64: 64, 1>}, {pipeline_mode = #tpu.pipeline_mode<synchronous>, transform_indices = @transform_5, window_bounds = array<i64: 64, 64>}, {pipeline_mode = #tpu.pipeline_mode<synchronous>, transform_indices = @transform_6, window_bounds = array<i64: 64, 1>}, {pipeline_mode = #tpu.pipeline_mode<synchronous>, transform_indices = @transform_7, window_bounds = array<i64: 64, 1>}, {pipeline_mode = #tpu.pipeline_mode<synchronous>, transform_indices = @transform_8, window_bounds = array<i64: 1, 1>}, {transform_indices = @transform_9, window_bounds = array<i64: 1, 256>}]} {
    %c0 = arith.constant 0 : index
    %c0_0 = arith.constant 0 : index
    %0 = vector.load %arg1[%c0, %c0_0] : memref<2x256xf32, #tpu.memory_space<vmem>>, vector<2x256xf32>
    %c0_1 = arith.constant 0 : index
    %c0_2 = arith.constant 0 : index
    %1 = vector.load %arg2[%c0_1, %c0_2] : memref<64x2xf32, #tpu.memory_space<vmem>>, vector<64x2xf32>
    %2 = vector.extract_strided_slice %1 {offsets = [0, 0], sizes = [64, 1], strides = [1, 1]} : vector<64x2xf32> to vector<64x1xf32>
    %3 = vector.extract_strided_slice %0 {offsets = [0, 0], sizes = [1, 256], strides = [1, 1]} : vector<2x256xf32> to vector<1x256xf32>
    %4 = vector.broadcast %2 : vector<64x1xf32> to vector<64x256xf32>
    %5 = vector.broadcast %3 : vector<1x256xf32> to vector<64x256xf32>
    %6 = arith.mulf %4, %5 : vector<64x256xf32>
    %7 = vector.extract_strided_slice %1 {offsets = [0, 1], sizes = [64, 1], strides = [1, 1]} : vector<64x2xf32> to vector<64x1xf32>
    %8 = vector.extract_strided_slice %0 {offsets = [1, 0], sizes = [1, 256], strides = [1, 1]} : vector<2x256xf32> to vector<1x256xf32>
    %9 = vector.broadcast %7 : vector<64x1xf32> to vector<64x256xf32>
    %10 = vector.broadcast %8 : vector<1x256xf32> to vector<64x256xf32>
    %11 = arith.mulf %9, %10 : vector<64x256xf32>
    %12 = arith.addf %6, %11 : vector<64x256xf32>
    %c0_3 = arith.constant 0 : index
    %c0_4 = arith.constant 0 : index
    %13 = vector.load %arg3[%c0_3, %c0_4] : memref<64x1xf32, #tpu.memory_space<vmem>>, vector<64x1xf32>
    %14 = vector.broadcast %13 : vector<64x1xf32> to vector<64x256xf32>
    %15 = arith.addf %12, %14 : vector<64x256xf32>
    %cst = arith.constant 0.000000e+00 : f32
    %16 = vector.broadcast %cst : f32 to vector<64x256xf32>
    %17 = arith.maximumf %15, %16 : vector<64x256xf32>
    %c0_5 = arith.constant 0 : index
    %c0_6 = arith.constant 0 : index
    %18 = vector.load %arg4[%c0_5, %c0_6] : memref<64x64xf32, #tpu.memory_space<vmem>>, vector<64x64xf32>
    %cst_7 = arith.constant dense<0.000000e+00> : vector<64x256xf32>
    %19 = tpu.matmul %18, %17, %cst_7 {dimension_numbers = #tpu.dot_dimension_numbers<[1], [0], [0], [1], [0, 0, 1, 1], [], []>} : vector<64x64xf32>, vector<64x256xf32>, vector<64x256xf32> -> vector<64x256xf32>
    %c0_8 = arith.constant 0 : index
    %c0_9 = arith.constant 0 : index
    %20 = vector.load %arg5[%c0_8, %c0_9] : memref<64x1xf32, #tpu.memory_space<vmem>>, vector<64x1xf32>
    %21 = vector.broadcast %20 : vector<64x1xf32> to vector<64x256xf32>
    %22 = arith.addf %19, %21 : vector<64x256xf32>
    %cst_10 = arith.constant 0.000000e+00 : f32
    %23 = vector.broadcast %cst_10 : f32 to vector<64x256xf32>
    %24 = arith.maximumf %22, %23 : vector<64x256xf32>
    %c0_11 = arith.constant 0 : index
    %c0_12 = arith.constant 0 : index
    %25 = vector.load %arg6[%c0_11, %c0_12] : memref<64x64xf32, #tpu.memory_space<vmem>>, vector<64x64xf32>
    %cst_13 = arith.constant dense<0.000000e+00> : vector<64x256xf32>
    %26 = tpu.matmul %25, %24, %cst_13 {dimension_numbers = #tpu.dot_dimension_numbers<[1], [0], [0], [1], [0, 0, 1, 1], [], []>} : vector<64x64xf32>, vector<64x256xf32>, vector<64x256xf32> -> vector<64x256xf32>
    %c0_14 = arith.constant 0 : index
    %c0_15 = arith.constant 0 : index
    %27 = vector.load %arg7[%c0_14, %c0_15] : memref<64x1xf32, #tpu.memory_space<vmem>>, vector<64x1xf32>
    %28 = vector.broadcast %27 : vector<64x1xf32> to vector<64x256xf32>
    %29 = arith.addf %26, %28 : vector<64x256xf32>
    %cst_16 = arith.constant 0.000000e+00 : f32
    %30 = vector.broadcast %cst_16 : f32 to vector<64x256xf32>
    %31 = arith.maximumf %29, %30 : vector<64x256xf32>
    %c0_17 = arith.constant 0 : index
    %c0_18 = arith.constant 0 : index
    %32 = vector.load %arg8[%c0_17, %c0_18] : memref<64x1xf32, #tpu.memory_space<vmem>>, vector<64x1xf32>
    %33 = vector.broadcast %32 : vector<64x1xf32> to vector<64x256xf32>
    %34 = arith.mulf %33, %31 : vector<64x256xf32>
    %cst_19 = arith.constant dense<0.000000e+00> : vector<256xf32>
    %35 = vector.multi_reduction <add>, %34, %cst_19 [0] : vector<64x256xf32> to vector<256xf32>
    %36 = vector.shape_cast %35 : vector<256xf32> to vector<1x256xf32>
    %c0_20 = arith.constant 0 : index
    %c0_21 = arith.constant 0 : index
    %37 = vector.load %arg9[%c0_20, %c0_21] : memref<1x1xf32, #tpu.memory_space<vmem>>, vector<1x1xf32>
    %38 = vector.broadcast %37 : vector<1x1xf32> to vector<1x256xf32>
    %39 = arith.addf %36, %38 : vector<1x256xf32>
    %c0_22 = arith.constant 0 : index
    %c0_23 = arith.constant 0 : index
    %40 = vector.load %arg10[%c0_22, %c0_23] : memref<1x256xf32, #tpu.memory_space<vmem>>, vector<1x256xf32>
    tpu.vector_store %arg10[%c0_22, %c0_23], %39 {strides = array<i32>} : memref<1x256xf32, #tpu.memory_space<vmem>>, vector<1x256xf32>,
    return
  }
  func.func @transform_0(%arg0: i32) -> (i32, i32) {
    %c0_i32 = arith.constant 0 : i32
    %c0_i32_0 = arith.constant 0 : i32
    return %c0_i32, %arg0 : i32, i32
  }
  func.func @transform_1(%arg0: i32) -> (i32, i32) {
    %c0_i32 = arith.constant 0 : i32
    %c0_i32_0 = arith.constant 0 : i32
    %c0_i32_1 = arith.constant 0 : i32
    return %c0_i32, %c0_i32_0 : i32, i32
  }
  func.func @transform_2(%arg0: i32) -> (i32, i32) {
    %c0_i32 = arith.constant 0 : i32
    %c0_i32_0 = arith.constant 0 : i32
    %c0_i32_1 = arith.constant 0 : i32
    return %c0_i32, %c0_i32_0 : i32, i32
  }
  func.func @transform_3(%arg0: i32) -> (i32, i32) {
    %c0_i32 = arith.constant 0 : i32
    %c0_i32_0 = arith.constant 0 : i32
    %c0_i32_1 = arith.constant 0 : i32
    return %c0_i32, %c0_i32_0 : i32, i32
  }
  func.func @transform_4(%arg0: i32) -> (i32, i32) {
    %c0_i32 = arith.constant 0 : i32
    %c0_i32_0 = arith.constant 0 : i32
    %c0_i32_1 = arith.constant 0 : i32
    return %c0_i32, %c0_i32_0 : i32, i32
  }
  func.func @transform_5(%arg0: i32) -> (i32, i32) {
    %c0_i32 = arith.constant 0 : i32
    %c0_i32_0 = arith.constant 0 : i32
    %c0_i32_1 = arith.constant 0 : i32
    return %c0_i32, %c0_i32_0 : i32, i32
  }
  func.func @transform_6(%arg0: i32) -> (i32, i32) {
    %c0_i32 = arith.constant 0 : i32
    %c0_i32_0 = arith.constant 0 : i32
    %c0_i32_1 = arith.constant 0 : i32
    return %c0_i32, %c0_i32_0 : i32, i32
  }
  func.func @transform_7(%arg0: i32) -> (i32, i32) {
    %c0_i32 = arith.constant 0 : i32
    %c0_i32_0 = arith.constant 0 : i32
    %c0_i32_1 = arith.constant 0 : i32
    return %c0_i32, %c0_i32_0 : i32, i32
  }
  func.func @transform_8(%arg0: i32) -> (i32, i32) {
    %c0_i32 = arith.constant 0 : i32
    %c0_i32_0 = arith.constant 0 : i32
    %c0_i32_1 = arith.constant 0 : i32
    return %c0_i32, %c0_i32_0 : i32, i32
  }
  func.func @transform_9(%arg0: i32) -> (i32, i32) {
    %c0_i32 = arith.constant 0 : i32
    %c0_i32_0 = arith.constant 0 : i32
    return %c0_i32, %arg0 : i32, i32
  }
}

</mosaic_0001>

<bundles_post_ra>
// kernel: tpu_custom_call.1
= control target key start
LH: loop header
LB: loop body
LE: loop exit
PB: predicated region body
PF: predicated region fallthrough
CT: control target
= control target key end

     0   :  { %s1798_s0 = inlined_call_operand.vmem [shape: f32[2,512], index: 0, kind: input, shape index: {}]   ;;  %s1799_s1 = inlined_call_operand.vmem [shape: f32[64,2], index: 1, kind: input, shape index: {}]   ;;  %s1800_s2 = inlined_call_operand.vmem [shape: f32[64,1], index: 2, kind: input, shape index: {}]   ;;  %s1801_s3 = inlined_call_operand.vmem [shape: f32[64,64], index: 3, kind: input, shape index: {}]   ;;  %s1802_s4 = inlined_call_operand.vmem [shape: f32[64,1], index: 4, kind: input, shape index: {}]   ;;  %s1803_s5 = inlined_call_operand.vmem [shape: f32[64,64], index: 5, kind: input, shape index: {}]   ;;  %s1804_s6 = inlined_call_operand.vmem [shape: f32[64,1], index: 6, kind: input, shape index: {}]   ;;  %s1805_s7 = inlined_call_operand.vmem [shape: f32[64,1], index: 7, kind: input, shape index: {}]   ;;  %s1806_s8 = inlined_call_operand.<no memory space> [shape: f32[1,1], index: 8, kind: input, shape index: {}]   ;;  %s1807_s9 = inlined_call_operand.hbm [shape: f32[1,512], index: 9, kind: output, shape index: {}]  }
   0x1   :  { %v14_v0 = vstv %s1806_s8 }
   0x2   :  { %15 = vst [vmem:[#allocation2] sm:$0x1] %v14_v0 }
   0x3   :  { %16 = vsyncpa [#allocation4], 0 }
   0x4   :  { %18 = vsyncpa [#allocation4 + $0x1], 0  ;;  %s1436_s11 = smov 0   ;;  %s1438_s12 = smov 0  }
   0x5   :  { %s1440_s13 = smov 0   ;;  %s1442_s14 = smov 0  }
   0x6 LB: > { %s1457_s8 = sadd.s32 4294967295, %s1376_s14   ;;  %s1200_s15 = sadd.s32 4294967294, %s1376_s14   ;;  %s1376_s14 = sphi %s1442_s14, %s1813_s14   ;;  %s1372_s13 = sphi %s1440_s13, %s1812_s13   ;;  %s1368_s12 = sphi %s1438_s12, %s1811_s12   ;;  %s1364_s11 = sphi %s1436_s11, %s1810_s11  }
   0x7   : > { %s1461_s16 = sadd.s32 1, %s1376_s14   ;;  %s225_s17 = sadd.s32 1, %s1372_s13 }
   0x8   : > { %s222_s18 = ssub.s32 %s1376_s14, %s1461_s16  ;;  %p235_p0 = scmp.ne.s32.totalorder %s1372_s13, %s1368_s12 }
   0x9   : > { %p223_p1 = scmp.eq.s32.totalorder %s222_s18, 0  ;;  %p236_p2 = scmp.eq.s32.totalorder %s1457_s8, 1 }
   0xa   : > { %p241_p3 = scmp.ne.s32.totalorder %s1368_s12, %s1364_s11  ;;  %p242_p4 = scmp.eq.s32.totalorder %s1200_s15, 1 }
   0xb   : > { %s1472_s19 = scalar_select %p223_p1, %s1372_s13, %s225_s17  }
   0xc   : > { %p1474_p5 = por %p236_p2, %p235_p0  ;;  %p1478_p6 = por %p242_p4, %p241_p3 }
   0xd   : > { %p1203_p7 = scmp.ge.s32.totalorder %s1376_s14, 1  ;;  %p293_p8 = scmp.lt.s32.totalorder %s1376_s14, 3 }
   0xf   : > { %p294_p9 = pnand %p1203_p7, %p293_p8 }
  0x10   : > { %v339_v1 = vld [vmem:[%s1799_s1 + $0x10] sm:$0xff] (!%p294_p9)  ;;  %v337_v2 = vld [vmem:[%s1799_s1] sm:$0xff] (!%p294_p9)  ;;  %v1378_v3 = vmov (!%p294_p9), 1   ;;  %v338_v5 = vld [vmem:[%s1799_s1 + $0x8] sm:$0xff] (!%p294_p9)  ;;  %v1379_v8 = vmov (!%p294_p9), 0   ;;  %v1380_v31 = vmov (!%p294_p9), 0.0   ;;  %v386_v45 = vlaneseq (!%p294_p9) }
  0x11   : > { %297 = sbr.rel (%p294_p9) target bundleno = 753 (0x2f1), region = 56  ;;  %1306 = vset.pattern.permute.xlu0 (!%p294_p9), %v1378_v3  ;;  %1304 = vset.pattern.permute.xlu1 (!%p294_p9), %v1378_v3  ;;  %v341_v4 = vld [vmem:[%s1799_s1 + $0x20] sm:$0xff] (!%p294_p9)  ;;  %v343_v6 = vld [vmem:[%s1799_s1 + $0x30] sm:$0xff] (!%p294_p9)  ;;  %v340_v7 = vld [vmem:[%s1799_s1 + $0x18] sm:$0xff] (!%p294_p9)  ;;  %s1205_s24 = sshll.u32 (!%p294_p9), %s1457_s8, 1  ;;  %vm638_vm0 = vcmask (!%p294_p9), 523264  }
  0x12   : > { %429 = vperm.xlu0 (!%p294_p9), %1306, %v339_v1   ;;  %421 = vperm.xlu1 (!%p294_p9), %1304, %v337_v2   ;;  %v502_v9 = vld [vmem:[%s1800_s2] sm:$0xff] (!%p294_p9)  ;;  %v503_v10 = vld [vmem:[%s1800_s2 + $0x8] sm:$0xff] (!%p294_p9)  ;;  %v505_v12 = vld [vmem:[%s1800_s2 + $0x18] sm:$0xff] (!%p294_p9)  ;;  %p330_p10 = scmp.lt.s32.totalorder (!%p294_p9), %s1205_s24, 3  ;;  %v1608_v48 = vshrl.u32 (!%p294_p9), %v386_v45, 7  ;;  %s326_s22 = sand.u32 (!%p294_p9), 1, %s1368_s12  }
  0x13   : > { %v342_v11 = vld [vmem:[%s1799_s1 + $0x28] sm:$0xff] (!%p294_p9)  ;;  %v590_v14 = vld [vmem:[%s1802_s4] sm:$0xff] (!%p294_p9)  ;;  %v504_v15 = vld [vmem:[%s1800_s2 + $0x10] sm:$0xff] (!%p294_p9)  ;;  %727 = vmatprep.mubr.f32.mxu0 (!%p294_p9), %v1380_v31  ;;  %936 = vmatprep.mubr.f32.mxu1 (!%p294_p9), %v1380_v31  ;;  %s1204_s23 = sshll.u32 (!%p294_p9), %s326_s22, 1  ;;  %vm1123_vm1 = vcmp.lt.s32.totalorder (!%p294_p9), %v386_v45, 256  ;;  %s1127_s30 = scalar_lea.sflag (!%p294_p9), [#allocation4], %s326_s22 }
  0x14   : > { %v507_v13 = vld [vmem:[%s1800_s2 + $0x28] sm:$0xff] (!%p294_p9)  ;;  %v592_v16 = vld [vmem:[%s1802_s4 + $0x10] sm:$0xff] (!%p294_p9)  ;;  %v594_v17 = vld [vmem:[%s1802_s4 + $0x20] sm:$0xff] (!%p294_p9)  ;;  %v454_v51 = vsub.s32 (!%p294_p9), 1, %v1608_v48  ;;  %v458_v52 = vsub.s32 (!%p294_p9), 3, %v1608_v48  ;;  %v1620_v54 = vsub.s32 (!%p294_p9), 0, %v1608_v48 }
  0x15   : > { %v344_v18 = vld [vmem:[%s1799_s1 + $0x38] sm:$0xff] (!%p294_p9)  ;;  %v596_v19 = vld [vmem:[%s1802_s4 + $0x30] sm:$0xff] (!%p294_p9)  ;;  %v800_v20 = vld [vmem:[%s1804_s6] sm:$0xff] (!%p294_p9)  ;;  %v392_v55 = vsub.s32 (!%p294_p9), 2, %v1608_v48 }
  0x16   : > { %437 = vperm.xlu0 (!%p294_p9), %1306, %v341_v4   ;;  %425 = vperm.xlu1 (!%p294_p9), %1304, %v338_v5   ;;  %v506_v21 = vld [vmem:[%s1800_s2 + $0x20] sm:$0xff] (!%p294_p9)  ;;  %v802_v22 = vld [vmem:[%s1804_s6 + $0x10] sm:$0xff] (!%p294_p9)  ;;  %v509_v25 = vld [vmem:[%s1800_s2 + $0x38] sm:$0xff] (!%p294_p9) }
  0x17   : > { %v508_v23 = vld [vmem:[%s1800_s2 + $0x30] sm:$0xff] (!%p294_p9)  ;;  %v1001_v24 = vld [vmem:[%s1805_s7] sm:$0xff] (!%p294_p9)  ;;  %v591_v27 = vld [vmem:[%s1802_s4 + $0x8] sm:$0xff] (!%p294_p9) }
  0x18   : > { %v804_v26 = vld [vmem:[%s1804_s6 + $0x20] sm:$0xff]  ;;  %v805_v28 = vld [vmem:[%s1804_s6 + $0x28] sm:$0xff]  ;;  %v593_v29 = vld [vmem:[%s1802_s4 + $0x18] sm:$0xff]  ;;  %s1815_s24 = smov (!%p330_p10, %s1205_s24), 3 }
  0x19   : > { %v806_v30 = vld [vmem:[%s1804_s6 + $0x30] sm:$0xff]  ;;  %v595_v32 = vld [vmem:[%s1802_s4 + $0x28] sm:$0xff]  ;;  %v807_v33 = vld [vmem:[%s1804_s6 + $0x38] sm:$0xff]  ;;  %s1206_s25 = sshll.u32 %s1815_s24, 1  ;;  %s1228_s24 = sshll.u32 %s1457_s8, 5 }
  0x1a   : > { %445 = vperm.xlu0 %1306, %v343_v6   ;;  %1305 = vset.pattern.permute.xlu1 %v1379_v8  ;;  %v597_v34 = vld [vmem:[%s1802_s4 + $0x38] sm:$0xff]  ;;  %v1007_v35 = vld [vmem:[%s1805_s7 + $0x30] sm:$0xff]  ;;  %v801_v36 = vld [vmem:[%s1804_s6 + $0x8] sm:$0xff]  ;;  %s333_s28 = scalar_lea.vmem %s1798_s0, %s1206_s25  ;;  %s328_s25 = scalar_lea.vmem [#allocation3], %s1204_s23 }
  0x1b   : > { %362 = vperm.xlu1 %1305, %v340_v7   ;;  %v1091_v37 = vld [vmem:[#allocation2] sm:$0x1]  ;;  %v803_v38 = vld [vmem:[%s1804_s6 + $0x18] sm:$0xff]  ;;  %v1002_v39 = vld [vmem:[%s1805_s7 + $0x8] sm:$0xff]  ;;  %s1141_s26 = sshll.u32 %s328_s25, 4  ;;  %s1756_s29 = scalar_lea.hbm %s1807_s9, %s1228_s24  ;;  %s1758_s26 = int_to_ptr.vmem [resolvable:$true] %s1141_s26 }
  0x1c   : > { %v1003_v40 = vld [vmem:[%s1805_s7 + $0x10] sm:$0xff]  ;;  %v1004_v41 = vld [vmem:[%s1805_s7 + $0x18] sm:$0xff]  ;;  %v1005_v42 = vld [vmem:[%s1805_s7 + $0x20] sm:$0xff]  ;;  %s1314_s10 = scalar_lea.vmem %s1758_s26, 32  ;;  %s1382_s8 = smov [#allocation3]  }
  0x1d   : > { %v1006_v43 = vld [vmem:[%s1805_s7 + $0x28] sm:$0xff]  ;;  %v1008_v44 = vld [vmem:[%s1805_s7 + $0x38] sm:$0xff]  ;;  %v336_v56 = vld [vmem:[%s333_s28] sm:$0xf]  ;;  %p1315_p11 = scmp.ne.s32.totalorder %s1758_s26, %s1314_s10  ;;  %s1318_s15 = sshll.u32 %s1382_s8, 4  ;;  %s1319_s15 = int_to_ptr.vmem [resolvable:$false] %s1318_s15 }
  0x1e   : > { %1311 = vset.pattern.permute.xlu0 %v1379_v8  ;;  %v455_v58 = vrot.slane %v336_v56, %v454_v51  ;;  %v459_v59 = vrot.slane %v336_v56, %v458_v52  ;;  %v389_v60 = vrot.slane %v336_v56, %v1620_v54  ;;  %v393_v61 = vrot.slane %v336_v56, %v392_v55  ;;  %s1320_s17 = scalar_lea.vmem %s1319_s15, 64  ;;  %p1321_p0 = scmp.lt.s32.totalorder %s1758_s26, %s1319_s15 }
  0x1f   : > { %347 = vperm.xlu0 %1311, %v337_v2   ;;  %1307 = vset.pattern.permute.xlu1 %v1378_v3  ;;  %p1316_p12 = pnand %p1315_p11, %p1474_p5  ;;  %p1322_p1 = scmp.lt.s32.totalorder %s1320_s17, %s1314_s10 }
  0x20   : > { %433 = vperm.xlu1 %1307, %v340_v7   ;;  %v1624_v0 = vrot.slane %v455_v58, %v454_v51  ;;  %v1629_v2 = vrot.slane %v389_v60, %v1620_v54 }
  0x21   : > { %p1317_p13 = pneg %p1316_p12  ;;  %p1323_p2 = por %p1322_p1, %p1321_p0 }
  0x23   : > { %352 = vperm.xlu0 %1311, %v338_v5   ;;  %p1324_p3 = pnand %p1323_p2, %p1317_p13 }
  0x24   : > { %1308 = vset.pattern.permute.xlu1 %v1379_v8 }
  0x25   : > { %512 = vperm.xlu1 %1308, %v502_v9  }
  0x27   : > { %357 = vperm.xlu0 %1311, %v339_v1   ;;  %v1626_v1 = vrot.slane %v459_v59, %v454_v51 }
  0x29   : > { %367 = vperm.xlu1 %1308, %v341_v4  }
  0x2b   : > { %517 = vperm.xlu0 %1311, %v503_v10  }
  0x2d   : > { %372 = vperm.xlu1 %1308, %v342_v11  }
  0x2f   : > { %527 = vperm.xlu0 %1311, %v505_v12  }
  0x31   : > { %1309 = vset.pattern.permute.xlu1 %v1378_v3 }
  0x32   : > { %441 = vperm.xlu1 %1309, %v342_v11  }
  0x33   : > { %537 = vperm.xlu0 %1311, %v507_v13  }
  0x36   : > { %1310 = vset.pattern.permute.xlu1 %v1379_v8 }
  0x37   : > { %600 = vperm.xlu0 %1311, %v590_v14   ;;  %522 = vperm.xlu1 %1310, %v504_v15  }
  0x3b   : > { %610 = vperm.xlu0 %1311, %v592_v16   ;;  %377 = vperm.xlu1 %1310, %v343_v6  }
  0x3f   : > { %620 = vperm.xlu0 %1311, %v594_v17   ;;  %382 = vperm.xlu1 %1310, %v344_v18  }
  0x43   : > { %630 = vperm.xlu0 %1311, %v596_v19   ;;  %1312 = vset.pattern.permute.xlu1 %v1378_v3  ;;  %v1632_v3 = vrot.slane %v393_v61, %v1620_v54 }
  0x44   : > { %449 = vperm.xlu1 %1312, %v344_v18  }
  0x47   : > { %810 = vperm.xlu0 %1311, %v800_v20  }
  0x48   : > { %1313 = vset.pattern.permute.xlu1 %v1379_v8 }
  0x49   : > { %532 = vperm.xlu1 %1313, %v506_v21  }
  0x4b   : > { %820 = vperm.xlu0 %1311, %v802_v22  }
  0x4d   : > { %542 = vperm.xlu1 %1313, %v508_v23  }
  0x4f   : > { %1011 = vperm.xlu0 %1311, %v1001_v24  }
  0x51   : > { %547 = vperm.xlu1 %1313, %v509_v25  }
  0x53   : > { %830 = vperm.xlu0 %1311, %v804_v26  }
  0x55   : > { %605 = vperm.xlu1 %1313, %v591_v27  }
  0x57   : > { %835 = vperm.xlu0 %1311, %v805_v28  }
  0x59   : > { %615 = vperm.xlu1 %1313, %v593_v29  }
  0x5b   : > { %840 = vperm.xlu0 %1311, %v806_v30  }
  0x5d   : > { %625 = vperm.xlu1 %1313, %v595_v32  }
  0x5f   : > { %845 = vperm.xlu0 %1311, %v807_v33  }
  0x61   : > { %635 = vperm.xlu1 %1313, %v597_v34  }
  0x63   : > { %1041 = vperm.xlu0 %1311, %v1007_v35  }
  0x65   : > { %815 = vperm.xlu1 %1313, %v801_v36  }
  0x67   : > { %1094 = vperm.xlu0 %1311, %v1091_v37  }
  0x69   : > { %825 = vperm.xlu1 %1313, %v803_v38  }
  0x6d   : > { %1016 = vperm.xlu1 %1313, %v1002_v39  }
  0x71   : > { %1021 = vperm.xlu1 %1313, %v1003_v40  }
  0x75   : > { %1026 = vperm.xlu1 %1313, %v1004_v41  }
  0x79   : > { %1031 = vperm.xlu1 %1313, %v1005_v42  }
  0x7d   : > { %1036 = vperm.xlu1 %1313, %v1006_v43  }
  0x81   : > { %1046 = vperm.xlu1 %1313, %v1008_v44  }
  0x91   : > { %v422_v46 = vpop.permute.xlu1 %421  ;;  %v430_v47 = vpop.permute.xlu0 %429 }
  0x92   : > { %v470_v8 = vmul.f32 %v1624_v0, %v422_v46  ;;  %v471_v9 = vmul.f32 %v1626_v1, %v422_v46  ;;  %v474_v35 = vmul.f32 %v1624_v0, %v430_v47  ;;  %v475_v36 = vmul.f32 %v1626_v1, %v430_v47 }
  0x95   : > { %v426_v49 = vpop.permute.xlu1 %425  ;;  %v1610_v50 = vpop.permute.xlu0 %437 }
  0x96   : > { %v472_v13 = vmul.f32 %v1624_v0, %v426_v49  ;;  %v473_v14 = vmul.f32 %v1626_v1, %v426_v49 }
  0x99   : > { %v1617_v53 = vpop.permute.xlu0 %445 }
  0x9a   : > { %v363_v57 = vpop.permute.xlu1 %362 }
  0x9b   : > { %v410_v37 = vmul.f32 %v1629_v2, %v363_v57  ;;  %v411_v38 = vmul.f32 %v1632_v3, %v363_v57 }
  0x9e   : > { %v348_v62 = vpop.permute.xlu0 %347 }
  0x9f   : > { %v434_v63 = vpop.permute.xlu1 %433  ;;  %v404_v5 = vmul.f32 %v1629_v2, %v348_v62  ;;  %v405_v6 = vmul.f32 %v1632_v3, %v348_v62 }
  0xa0   : > { %v476_v30 = vmul.f32 %v1624_v0, %v434_v63  ;;  %v477_v32 = vmul.f32 %v1626_v1, %v434_v63 }
  0xa1   : > { %v486_v15 = vadd.f32 %v470_v8, %v404_v5  ;;  %v487_v16 = vadd.f32 %v471_v9, %v405_v6 }
  0xa2   : > { %v353_v4 = vpop.permute.xlu0 %352  ;;  %v492_v43 = vadd.f32 %v476_v30, %v410_v37  ;;  %v493_v44 = vadd.f32 %v477_v32, %v411_v38 }
  0xa3   : > { %v406_v10 = vmul.f32 %v1629_v2, %v353_v4  ;;  %v407_v11 = vmul.f32 %v1632_v3, %v353_v4 }
  0xa4   : > { %v513_v7 = vpop.permute.xlu1 %512 }
  0xa5   : > { %v550_v18 = vadd.f32 %v513_v7, %v486_v15  ;;  %v551_v19 = vadd.f32 %v513_v7, %v487_v16  ;;  %v488_v20 = vadd.f32 %v472_v13, %v406_v10  ;;  %v489_v21 = vadd.f32 %v473_v14, %v407_v11 }
  0xa6   : > { %v358_v12 = vpop.permute.xlu0 %357  ;;  %v478_v11 = vmul.f32 %v1624_v0, %v1610_v50 }
  0xa7   : > { %v566_v26 = vmax.f32 %v550_v18, 0.0  ;;  %v567_v28 = vmax.f32 %v551_v19, 0.0  ;;  %v408_v39 = vmul.f32 %v1629_v2, %v358_v12  ;;  %v409_v40 = vmul.f32 %v1632_v3, %v358_v12 }
  0xa8   : > { %v368_v17 = vpop.permute.xlu1 %367  ;;  %v479_v12 = vmul.f32 %v1626_v1, %v1610_v50  ;;  %v482_v50 = vmul.f32 %v1624_v0, %v1617_v53 }
  0xa9   : > { %v490_v51 = vadd.f32 %v474_v35, %v408_v39  ;;  %v491_v52 = vadd.f32 %v475_v36, %v409_v40  ;;  %v412_v13 = vmul.f32 %v1629_v2, %v368_v17  ;;  %v413_v14 = vmul.f32 %v1632_v3, %v368_v17 }
  0xaa   : > { %v518_v22 = vpop.permute.xlu0 %517 }
  0xab   : > { %v552_v23 = vadd.f32 %v518_v22, %v488_v20  ;;  %v553_v24 = vadd.f32 %v518_v22, %v489_v21  ;;  %v494_v20 = vadd.f32 %v478_v11, %v412_v13  ;;  %v495_v21 = vadd.f32 %v479_v12, %v413_v14 }
  0xac   : > { %v373_v25 = vpop.permute.xlu1 %372 }
  0xad   : > { %v568_v27 = vmax.f32 %v552_v23, 0.0  ;;  %v569_v29 = vmax.f32 %v553_v24, 0.0  ;;  %v414_v7 = vmul.f32 %v1629_v2, %v373_v25  ;;  %v415_v8 = vmul.f32 %v1632_v3, %v373_v25 }
  0xae   : > { %v528_v42 = vpop.permute.xlu0 %527 }
  0xaf   : > { %v1229_v33 = vpack.c.bf16 %v569_v29, %v567_v28  ;;  %v1231_v34 = vpack.c.bf16 %v568_v27, %v566_v26  ;;  %v556_v46 = vadd.f32 %v528_v42, %v492_v43  ;;  %v557_v49 = vadd.f32 %v528_v42, %v493_v44 }
  0xb0   : > { %v483_v27 = vmul.f32 %v1626_v1, %v1617_v53 }
  0xb1   : > { %v442_v41 = vpop.permute.xlu1 %441  ;;  %1230 = vmatprep.subr.bf16.mxu0 %v1229_v33  ;;  %v572_v58 = vmax.f32 %v556_v46, 0.0  ;;  %v573_v59 = vmax.f32 %v557_v49, 0.0 }
  0xb2   : > { %1232 = vmatpush1.bf16.msra.mxu0 %v1231_v34  ;;  %v480_v4 = vmul.f32 %v1624_v0, %v442_v41  ;;  %v481_v5 = vmul.f32 %v1626_v1, %v442_v41  ;;  %v538_v16 = vpop.permute.xlu0 %537 }
  0xb4   : > { %v496_v9 = vadd.f32 %v480_v4, %v414_v7  ;;  %v497_v10 = vadd.f32 %v481_v5, %v415_v8 }
  0xb6   : > { %v523_v55 = vpop.permute.xlu1 %522  ;;  %v560_v18 = vadd.f32 %v538_v16, %v496_v9  ;;  %v561_v19 = vadd.f32 %v538_v16, %v497_v10  ;;  %v601_v4 = vpop.permute.xlu0 %600 }
  0xb7   : > { %v554_v47 = vadd.f32 %v523_v55, %v490_v51  ;;  %v555_v56 = vadd.f32 %v523_v55, %v491_v52 }
  0xb8   : > { %v576_v17 = vmax.f32 %v560_v18, 0.0  ;;  %v577_v28 = vmax.f32 %v561_v19, 0.0 }
  0xb9   : > { %v570_v57 = vmax.f32 %v554_v47, 0.0  ;;  %v571_v60 = vmax.f32 %v555_v56, 0.0  ;;  %v584_v56 = vld [vmem:[%s1801_s3 + $0x10] sm:$0xff] }
  0xba   : > { %v378_v61 = vpop.permute.xlu1 %377 }
  0xbb   : > { %v1233_v62 = vpack.c.bf16 %v573_v59, %v571_v60  ;;  %v1235_v63 = vpack.c.bf16 %v572_v58, %v570_v57  ;;  %v416_v22 = vmul.f32 %v1629_v2, %v378_v61  ;;  %v417_v23 = vmul.f32 %v1632_v3, %v378_v61  ;;  %v585_v58 = vld [vmem:[%s1801_s3 + $0x18] sm:$0xff]  ;;  %v586_v59 = vld [vmem:[%s1801_s3 + $0x20] sm:$0xff]  ;;  %v587_v57 = vld [vmem:[%s1801_s3 + $0x28] sm:$0xff] }
  0xbc   : > { %v588_v60 = vld [vmem:[%s1801_s3 + $0x30] sm:$0xff]  ;;  %v589_v61 = vld [vmem:[%s1801_s3 + $0x38] sm:$0xff] }
  0xbd   : > { %1234 = vmatprep.subr.bf16.mxu0 %v1233_v62  ;;  %v498_v35 = vadd.f32 %v482_v50, %v416_v22  ;;  %v499_v36 = vadd.f32 %v483_v27, %v417_v23 }
  0xbe   : > { %v383_v6 = vpop.permute.xlu1 %382  ;;  %1236 = vmatpush1.bf16.msra.mxu0 %v1235_v63 }
  0xbf   : > { %v418_v37 = vmul.f32 %v1629_v2, %v383_v6  ;;  %v419_v38 = vmul.f32 %v1632_v3, %v383_v6  ;;  %v582_v2 = vld [vmem:[%s1801_s3] sm:$0xff]  ;;  %v583_v3 = vld [vmem:[%s1801_s3 + $0x8] sm:$0xff] }
  0xc3   : > { %v450_v15 = vpop.permute.xlu1 %449 }
  0xc4   : > { %v484_v29 = vmul.f32 %v1624_v0, %v450_v15  ;;  %v485_v30 = vmul.f32 %v1626_v1, %v450_v15 }
  0xc6   : > { %v500_v53 = vadd.f32 %v484_v29, %v418_v37  ;;  %v501_v43 = vadd.f32 %v485_v30, %v419_v38 }
  0xc8   : > { %v533_v24 = vpop.permute.xlu1 %532 }
  0xc9   : > { %v558_v25 = vadd.f32 %v533_v24, %v494_v20  ;;  %v559_v26 = vadd.f32 %v533_v24, %v495_v21  ;;  %v611_v20 = vpop.permute.xlu0 %610 }
  0xcb   : > { %v574_v32 = vmax.f32 %v558_v25, 0.0  ;;  %v575_v33 = vmax.f32 %v559_v26, 0.0 }
  0xcc   : > { %v543_v34 = vpop.permute.xlu1 %542 }
  0xcd   : > { %v1237_v39 = vpack.c.bf16 %v577_v28, %v575_v33  ;;  %v1239_v40 = vpack.c.bf16 %v576_v17, %v574_v32  ;;  %v562_v41 = vadd.f32 %v543_v34, %v498_v35  ;;  %v563_v42 = vadd.f32 %v543_v34, %v499_v36  ;;  %v621_v35 = vpop.permute.xlu0 %620 }
  0xcf   : > { %1238 = vmatprep.subr.bf16.mxu0 %v1237_v39  ;;  %v578_v46 = vmax.f32 %v562_v41, 0.0  ;;  %v579_v49 = vmax.f32 %v563_v42, 0.0 }
  0xd0   : > { %v548_v44 = vpop.permute.xlu1 %547  ;;  %1240 = vmatpush1.bf16.msra.mxu0 %v1239_v40 }
  0xd1   : > { %v564_v0 = vadd.f32 %v548_v44, %v500_v53  ;;  %v565_v1 = vadd.f32 %v548_v44, %v501_v43 }
  0xd3   : > { %v580_v51 = vmax.f32 %v564_v0, 0.0  ;;  %v581_v52 = vmax.f32 %v565_v1, 0.0 }
  0xd4   : > { %v606_v6 = vpop.permute.xlu1 %605 }
  0xd5   : > { %v1241_v55 = vpack.c.bf16 %v581_v52, %v579_v49  ;;  %v1243_v47 = vpack.c.bf16 %v580_v51, %v578_v46  ;;  %v631_v52 = vpop.permute.xlu0 %630 }
  0xd7   : > { %1242 = vmatprep.subr.bf16.mxu0 %v1241_v55 }
  0xd8   : > { %1244 = vmatpush1.bf16.msra.mxu0 %v1243_v47  ;;  %v616_v23 = vpop.permute.xlu1 %615 }
  0xdb   : > { %1207 = vmatmul.mubr.msk.f32.vlgmr.msra.gmra.mrb[0].mxu0 %vm638_vm0, %v582_v2 }
  0xdc   : > { %733 = vmatprep.mubr.f32.mxu0 %v1380_v31  ;;  %v626_v38 = vpop.permute.xlu1 %625 }
  0xdf   : > { %1208 = vmatmul.mubr.msk.f32.gmra.mrb[2].mxu0 %vm638_vm0, %v583_v3 }
  0xe0   : > { %739 = vmatprep.mubr.f32.mxu0 %v1380_v31  ;;  %v636_v2 = vpop.permute.xlu1 %635 }
  0xe3   : > { %1209 = vmatmul.mubr.msk.f32.gmra.mrb[4].mxu0 %vm638_vm0, %v584_v56 }
  0xe4   : > { %745 = vmatprep.mubr.f32.mxu0 %v1380_v31 }
  0xe7   : > { %1210 = vmatmul.mubr.msk.f32.gmra.mrb[6].mxu0 %vm638_vm0, %v585_v58 }
  0xe8   : > { %751 = vmatprep.mubr.f32.mxu0 %v1380_v31 }
  0xeb   : > { %1211 = vmatmul.mubr.msk.f32.gmra.mrb[8].mxu0 %vm638_vm0, %v586_v59 }
  0xec   : > { %757 = vmatprep.mubr.f32.mxu0 %v1380_v31 }
  0xef   : > { %1212 = vmatmul.mubr.msk.f32.gmra.mrb[10].mxu0 %vm638_vm0, %v587_v57 }
  0xf0   : > { %763 = vmatprep.mubr.f32.mxu0 %v1380_v31 }
  0xf3   : > { %1213 = vmatmul.mubr.msk.f32.gmra.mrb[12].mxu0 %vm638_vm0, %v588_v60 }
  0xf4   : > { %769 = vmatprep.mubr.f32.mxu0 %v1380_v31 }
  0xf7   : > { %1214 = vmatmul.mubr.msk.f32.gmra.mrb[14].mxu0 %vm638_vm0, %v589_v61 }
 0x1ae   : > { %v729_v62 = vpop.f32.mrb[0].mxu0 }
 0x1af   : > { %v731_v63 = vpop.f32.mrb[1].mxu0  ;;  %v730_v5 = vadd.f32 %v729_v62, %v601_v4 }
 0x1b0   : > { %v732_v7 = vadd.f32 %v731_v63, %v601_v4 }
 0x1b1   : > { %v776_v12 = vmax.f32 %v730_v5, 0.0 }
 0x1b2   : > { %v735_v8 = vpop.f32.mrb[2].mxu0  ;;  %v777_v14 = vmax.f32 %v732_v7, 0.0  ;;  %v793_v7 = vld [vmem:[%s1803_s5 + $0x8] sm:$0xff] }
 0x1b3   : > { %v736_v9 = vadd.f32 %v735_v8, %v606_v6  ;;  %v737_v10 = vpop.f32.mrb[3].mxu0  ;;  %v794_v8 = vld [vmem:[%s1803_s5 + $0x10] sm:$0xff] }
 0x1b4   : > { %v738_v11 = vadd.f32 %v737_v10, %v606_v6  ;;  %v792_v6 = vld [vmem:[%s1803_s5] sm:$0xff] }
 0x1b5   : > { %v778_v13 = vmax.f32 %v736_v9, 0.0  ;;  %v795_v9 = vld [vmem:[%s1803_s5 + $0x18] sm:$0xff]  ;;  %v796_v10 = vld [vmem:[%s1803_s5 + $0x20] sm:$0xff] }
 0x1b6   : > { %v779_v15 = vmax.f32 %v738_v11, 0.0  ;;  %v741_v16 = vpop.f32.mrb[4].mxu0  ;;  %v797_v11 = vld [vmem:[%s1803_s5 + $0x28] sm:$0xff] }
 0x1b7   : > { %v743_v18 = vpop.f32.mrb[5].mxu0  ;;  %v1247_v19 = vpack.c.bf16 %v778_v13, %v776_v12  ;;  %v742_v22 = vadd.f32 %v741_v16, %v611_v20  ;;  %v798_v12 = vld [vmem:[%s1803_s5 + $0x30] sm:$0xff]  ;;  %v799_v13 = vld [vmem:[%s1803_s5 + $0x38] sm:$0xff] }
 0x1b8   : > { %v1245_v21 = vpack.c.bf16 %v779_v15, %v777_v14  ;;  %v744_v24 = vadd.f32 %v743_v18, %v611_v20  ;;  %v811_v14 = vpop.permute.xlu0 %810  ;;  %v816_v15 = vpop.permute.xlu1 %815 }
 0x1b9   : > { %v780_v17 = vmax.f32 %v742_v22, 0.0 }
 0x1ba   : > { %v747_v25 = vpop.f32.mrb[6].mxu0  ;;  %1246 = vmatprep.subr.bf16.mxu1 %v1245_v21  ;;  %v781_v29 = vmax.f32 %v744_v24, 0.0 }
 0x1bb   : > { %v748_v26 = vadd.f32 %v747_v25, %v616_v23  ;;  %v749_v50 = vpop.f32.mrb[7].mxu0  ;;  %1248 = vmatpush1.bf16.msra.mxu1 %v1247_v19 }
 0x1bc   : > { %v750_v27 = vadd.f32 %v749_v50, %v616_v23  ;;  %v821_v16 = vpop.permute.xlu0 %820  ;;  %v826_v18 = vpop.permute.xlu1 %825 }
 0x1bd   : > { %v782_v28 = vmax.f32 %v748_v26, 0.0 }
 0x1be   : > { %v783_v30 = vmax.f32 %v750_v27, 0.0  ;;  %v753_v32 = vpop.f32.mrb[8].mxu0 }
 0x1bf   : > { %v1251_v33 = vpack.c.bf16 %v782_v28, %v780_v17  ;;  %v755_v34 = vpop.f32.mrb[9].mxu0  ;;  %v754_v37 = vadd.f32 %v753_v32, %v621_v35 }
 0x1c0   : > { %v1249_v36 = vpack.c.bf16 %v783_v30, %v781_v29  ;;  %v756_v39 = vadd.f32 %v755_v34, %v621_v35  ;;  %v1012_v19 = vpop.permute.xlu0 %1011  ;;  %v1017_v20 = vpop.permute.xlu1 %1016 }
 0x1c1   : > { %v784_v43 = vmax.f32 %v754_v37, 0.0 }
 0x1c2   : > { %v759_v40 = vpop.f32.mrb[10].mxu0  ;;  %1250 = vmatprep.subr.bf16.mxu1 %v1249_v36  ;;  %v785_v0 = vmax.f32 %v756_v39, 0.0 }
 0x1c3   : > { %v760_v41 = vadd.f32 %v759_v40, %v626_v38  ;;  %v761_v42 = vpop.f32.mrb[11].mxu0  ;;  %1252 = vmatpush1.bf16.msra.mxu1 %v1251_v33 }
 0x1c4   : > { %v762_v53 = vadd.f32 %v761_v42, %v626_v38  ;;  %v831_v25 = vpop.permute.xlu0 %830  ;;  %v1022_v17 = vpop.permute.xlu1 %1021 }
 0x1c5   : > { %v786_v44 = vmax.f32 %v760_v41, 0.0 }
 0x1c6   : > { %v787_v1 = vmax.f32 %v762_v53, 0.0  ;;  %v765_v46 = vpop.f32.mrb[12].mxu0 }
 0x1c7   : > { %v1255_v49 = vpack.c.bf16 %v786_v44, %v784_v43  ;;  %v767_v51 = vpop.f32.mrb[13].mxu0  ;;  %v766_v47 = vadd.f32 %v765_v46, %v631_v52 }
 0x1c8   : > { %v1253_v55 = vpack.c.bf16 %v787_v1, %v785_v0  ;;  %v768_v3 = vadd.f32 %v767_v51, %v631_v52  ;;  %v836_v38 = vpop.permute.xlu0 %835  ;;  %v1027_v43 = vpop.permute.xlu1 %1026 }
 0x1c9   : > { %v788_v60 = vmax.f32 %v766_v47, 0.0 }
 0x1ca   : > { %v771_v56 = vpop.f32.mrb[14].mxu0  ;;  %1254 = vmatprep.subr.bf16.mxu1 %v1253_v55  ;;  %v789_v62 = vmax.f32 %v768_v3, 0.0 }
 0x1cb   : > { %v772_v58 = vadd.f32 %v771_v56, %v636_v2  ;;  %v773_v59 = vpop.f32.mrb[15].mxu0  ;;  %1256 = vmatpush1.bf16.msra.mxu1 %v1255_v49 }
 0x1cc   : > { %v774_v57 = vadd.f32 %v773_v59, %v636_v2  ;;  %v841_v3 = vpop.permute.xlu0 %840 }
 0x1cd   : > { %v790_v61 = vmax.f32 %v772_v58, 0.0 }
 0x1ce   : > { %v791_v63 = vmax.f32 %v774_v57, 0.0 }
 0x1cf   : > { %v1259_v4 = vpack.c.bf16 %v790_v61, %v788_v60 }
 0x1d0   : > { %v1257_v5 = vpack.c.bf16 %v791_v63, %v789_v62  ;;  %v1032_v62 = vpop.permute.xlu1 %1031 }
 0x1d2   : > { %1258 = vmatprep.subr.bf16.mxu1 %v1257_v5 }
 0x1d3   : > { %1260 = vmatpush1.bf16.msra.mxu1 %v1259_v4 }
 0x1d6   : > { %1215 = vmatmul.mubr.msk.f32.vlgmr.msra.gmra.mrb[0].mxu1 %vm638_vm0, %v792_v6 }
 0x1d7   : > { %942 = vmatprep.mubr.f32.mxu1 %v1380_v31 }
 0x1da   : > { %1216 = vmatmul.mubr.msk.f32.gmra.mrb[2].mxu1 %vm638_vm0, %v793_v7 }
 0x1db   : > { %948 = vmatprep.mubr.f32.mxu1 %v1380_v31 }
 0x1de   : > { %1217 = vmatmul.mubr.msk.f32.gmra.mrb[4].mxu1 %vm638_vm0, %v794_v8 }
 0x1df   : > { %954 = vmatprep.mubr.f32.mxu1 %v1380_v31 }
 0x1e2   : > { %1218 = vmatmul.mubr.msk.f32.gmra.mrb[6].mxu1 %vm638_vm0, %v795_v9 }
 0x1e3   : > { %960 = vmatprep.mubr.f32.mxu1 %v1380_v31 }
 0x1e6   : > { %1219 = vmatmul.mubr.msk.f32.gmra.mrb[8].mxu1 %vm638_vm0, %v796_v10 }
 0x1e7   : > { %966 = vmatprep.mubr.f32.mxu1 %v1380_v31 }
 0x1ea   : > { %1220 = vmatmul.mubr.msk.f32.gmra.mrb[10].mxu1 %vm638_vm0, %v797_v11 }
 0x1eb   : > { %972 = vmatprep.mubr.f32.mxu1 %v1380_v31 }
 0x1ee   : > { %1221 = vmatmul.mubr.msk.f32.gmra.mrb[12].mxu1 %vm638_vm0, %v798_v12 }
 0x1ef   : > { %978 = vmatprep.mubr.f32.mxu1 %v1380_v31 }
 0x1f2   : > { %1222 = vmatmul.mubr.msk.f32.gmra.mrb[14].mxu1 %vm638_vm0, %v799_v13  ;;  %v846_v13 = vpop.permute.xlu0 %845 }
 0x2a9   : > { %v938_v21 = vpop.f32.mrb[0].mxu1 }
 0x2aa   : > { %v939_v22 = vadd.f32 %v938_v21, %v811_v14  ;;  %v940_v23 = vpop.f32.mrb[1].mxu1 }
 0x2ab   : > { %v941_v24 = vadd.f32 %v940_v23, %v811_v14 }
 0x2ac   : > { %v985_v50 = vmax.f32 %v939_v22, 0.0 }
 0x2ad   : > { %v944_v26 = vpop.f32.mrb[2].mxu1  ;;  %v986_v28 = vmax.f32 %v941_v24, 0.0 }
 0x2ae   : > { %v945_v31 = vadd.f32 %v944_v26, %v816_v15  ;;  %v946_v27 = vpop.f32.mrb[3].mxu1  ;;  %v1049_v34 = vmul.f32 %v1012_v19, %v985_v50 }
 0x2af   : > { %v947_v29 = vadd.f32 %v946_v27, %v816_v15  ;;  %v1050_v39 = vmul.f32 %v1012_v19, %v986_v28  ;;  %v1037_v19 = vpop.permute.xlu1 %1036 }
 0x2b0   : > { %v987_v30 = vmax.f32 %v945_v31, 0.0 }
 0x2b1   : > { %v988_v32 = vmax.f32 %v947_v29, 0.0  ;;  %v950_v33 = vpop.f32.mrb[4].mxu1 }
 0x2b2   : > { %v1051_v35 = vmul.f32 %v1017_v20, %v987_v30  ;;  %v951_v36 = vadd.f32 %v950_v33, %v821_v16  ;;  %v952_v37 = vpop.f32.mrb[5].mxu1 }
 0x2b3   : > { %v1052_v40 = vmul.f32 %v1017_v20, %v988_v32  ;;  %v953_v41 = vadd.f32 %v952_v37, %v821_v16 }
 0x2b4   : > { %v1065_v42 = vadd.f32 %v1051_v35, %v1049_v34  ;;  %v989_v53 = vmax.f32 %v951_v36, 0.0 }
 0x2b5   : > { %v1078_v44 = vadd.f32 %v1052_v40, %v1050_v39  ;;  %v990_v0 = vmax.f32 %v953_v41, 0.0  ;;  %v956_v1 = vpop.f32.mrb[6].mxu1  ;;  %v1047_v39 = vpop.permute.xlu1 %1046 }
 0x2b6   : > { %v1053_v46 = vmul.f32 %v1022_v17, %v989_v53  ;;  %v957_v49 = vadd.f32 %v956_v1, %v826_v18  ;;  %v958_v51 = vpop.f32.mrb[7].mxu1 }
 0x2b7   : > { %v1054_v52 = vmul.f32 %v1022_v17, %v990_v0  ;;  %v959_v55 = vadd.f32 %v958_v51, %v826_v18  ;;  %v1042_v17 = vpop.permute.xlu0 %1041 }
 0x2b8   : > { %v1066_v47 = vadd.f32 %v1065_v42, %v1053_v46  ;;  %v991_v2 = vmax.f32 %v957_v49, 0.0 }
 0x2b9   : > { %v1079_v56 = vadd.f32 %v1078_v44, %v1054_v52  ;;  %v992_v58 = vmax.f32 %v959_v55, 0.0  ;;  %v962_v59 = vpop.f32.mrb[8].mxu1  ;;  %v1381_v55 = vmov 1966171168  }
 0x2ba   : > { %v1055_v57 = vmul.f32 %v1027_v43, %v991_v2  ;;  %v963_v60 = vadd.f32 %v962_v59, %v831_v25  ;;  %v964_v61 = vpop.f32.mrb[9].mxu1 }
 0x2bb   : > { %v1056_v63 = vmul.f32 %v1027_v43, %v992_v58  ;;  %v965_v4 = vadd.f32 %v964_v61, %v831_v25 }
 0x2bc   : > { %v1067_v5 = vadd.f32 %v1066_v47, %v1055_v57  ;;  %v993_v6 = vmax.f32 %v963_v60, 0.0  ;;  %v1107_v47 = vunpack.c.l.s4 %v1381_v55 }
 0x2bd   : > { %v1080_v7 = vadd.f32 %v1079_v56, %v1056_v63  ;;  %v994_v8 = vmax.f32 %v965_v4, 0.0  ;;  %v968_v9 = vpop.f32.mrb[10].mxu1 }
 0x2be   : > { %v1057_v10 = vmul.f32 %v1032_v62, %v993_v6  ;;  %v969_v11 = vadd.f32 %v968_v9, %v836_v38  ;;  %v970_v12 = vpop.f32.mrb[11].mxu1  ;;  %v1108_v57 = vunpack.c.0.s8 %v1107_v47 }
 0x2bf   : > { %v1058_v14 = vmul.f32 %v1032_v62, %v994_v8  ;;  %v971_v15 = vadd.f32 %v970_v12, %v836_v38 }
 0x2c0   : > { %v1068_v16 = vadd.f32 %v1067_v5, %v1057_v10  ;;  %v995_v18 = vmax.f32 %v969_v11, 0.0  ;;  %v1111_v5 = vsub.s32 %v1108_v57, %v1608_v48 }
 0x2c1   : > { %v1081_v20 = vadd.f32 %v1080_v7, %v1058_v14  ;;  %v996_v21 = vmax.f32 %v971_v15, 0.0  ;;  %v974_v22 = vpop.f32.mrb[12].mxu1 }
 0x2c2   : > { %v1059_v23 = vmul.f32 %v1037_v19, %v995_v18  ;;  %v975_v24 = vadd.f32 %v974_v22, %v841_v3  ;;  %v976_v25 = vpop.f32.mrb[13].mxu1 }
 0x2c3   : > { %v1060_v26 = vmul.f32 %v1037_v19, %v996_v21  ;;  %v977_v50 = vadd.f32 %v976_v25, %v841_v3  ;;  %v1095_v3 = vpop.permute.xlu0 %1094 }
 0x2c4   : > { %v1069_v31 = vadd.f32 %v1068_v16, %v1059_v23  ;;  %v997_v27 = vmax.f32 %v975_v24, 0.0  ;;  %v1100_v60 = vrot.slane %v1095_v3, %v1620_v54 }
 0x2c5   : > { %v1082_v28 = vadd.f32 %v1081_v20, %v1060_v26  ;;  %v998_v29 = vmax.f32 %v977_v50, 0.0  ;;  %v980_v30 = vpop.f32.mrb[14].mxu1 }
 0x2c6   : > { %v1061_v32 = vmul.f32 %v1042_v17, %v997_v27  ;;  %v981_v33 = vadd.f32 %v980_v30, %v846_v13  ;;  %v982_v34 = vpop.f32.mrb[15].mxu1 }
 0x2c7   : > { %v1062_v35 = vmul.f32 %v1042_v17, %v998_v29  ;;  %v983_v36 = vadd.f32 %v982_v34, %v846_v13 }
 0x2c8   : > { %v1070_v37 = vadd.f32 %v1069_v31, %v1061_v32  ;;  %v999_v38 = vmax.f32 %v981_v33, 0.0 }
 0x2c9   : > { %v1083_v40 = vadd.f32 %v1082_v28, %v1062_v35  ;;  %v1000_v41 = vmax.f32 %v983_v36, 0.0 }
 0x2ca   : > { %v1063_v42 = vmul.f32 %v1047_v39, %v999_v38 }
 0x2cb   : > { %v1064_v53 = vmul.f32 %v1047_v39, %v1000_v41 }
 0x2cc   : > { %v1071_v43 = vadd.f32 %v1070_v37, %v1063_v42 }
 0x2cd   : > { %v1084_v44 = vadd.f32 %v1083_v40, %v1064_v53 }
 0x2ce   : > { %v1072_v0 = vrot.slane %v1071_v43, 4 }
 0x2cf   : > { %v1085_v1 = vrot.slane %v1084_v44, 4 }
 0x2d0   : > { %v1073_v46 = vadd.f32 %v1072_v0, %v1071_v43 }
 0x2d1   : > { %v1086_v49 = vadd.f32 %v1085_v1, %v1084_v44 }
 0x2d2   : > { %v1074_v51 = vrot.slane %v1073_v46, 2 }
 0x2d3   : > { %v1087_v52 = vrot.slane %v1086_v49, 2 }
 0x2d4   : > { %v1075_v2 = vadd.f32 %v1074_v51, %v1073_v46 }
 0x2d5   : > { %v1088_v56 = vadd.f32 %v1087_v52, %v1086_v49 }
 0x2d6   : > { %v1076_v58 = vrot.slane %v1075_v2, 1 }
 0x2d7   : > { %v1089_v59 = vrot.slane %v1088_v56, 1 }
 0x2d8   : > { %v1077_v61 = vadd.f32 %v1076_v58, %v1075_v2 }
 0x2d9   : > { %v1090_v62 = vadd.f32 %v1089_v59, %v1088_v56 }
 0x2da   : > { %v1101_v63 = vadd.f32 %v1100_v60, %v1077_v61 }
 0x2db   : > { %v1102_v4 = vadd.f32 %v1100_v60, %v1090_v62 }
 0x2dd   : > { %v1105_v6 = vcombine.low %v1101_v63, %v1102_v4 }
 0x2df   : > { %v1112_v7 = vrot.slane %v1105_v6, %v1111_v5 }
 0x2e1   : > { %v1119_v8 = vrot.slane %v1112_v7, %v1111_v5 }
 0x2e3   : > { %1125 = vst.msk [vmem:[%s328_s25] sm:$0x3] %vm1123_vm1, %v1119_v8 }
 0x2e4   : > { %1327 = shalt.err (!%p1324_p3)
}
 0x2e5   : > { %s1328_s18 = scalar_lea.hbm %s1756_s29, 32  ;;  %s1332_s24 = scalar_lea.hbm %s1807_s9, 64 }
 0x2e6   : > { %p1329_p4 = scmp.ne.s32.totalorder %s1756_s29, %s1328_s18  ;;  %p1333_p9 = scmp.lt.u32.totalorder %s1756_s29, %s1807_s9 }
 0x2e7   : > { %p1334_p10 = scmp.lt.u32.totalorder %s1332_s24, %s1328_s18  ;;  %p1336_p12 = scmp.lt.u32.totalorder %s1328_s18, %s1756_s29 }
 0x2e8   : > { %p1330_p7 = pnand %p1329_p4, %p1474_p5 }
 0x2e9   : > { %p1335_p11 = por %p1334_p10, %p1333_p9 }
 0x2ea   : > { %p1331_p8 = pneg %p1330_p7 }
 0x2eb   : > { %p1337_p13 = por %p1336_p12, %p1335_p11 }
 0x2ed   : > { %p1338_p0 = pnand %p1337_p13, %p1331_p8 }
 0x2ef   : > { %1341 = shalt.err (!%p1338_p0)
}
 0x2f0   : > { %1261 = dma.vmem_to_hbm [thread:$0]  (%p1474_p5), %s1758_s26, 32, %s1756_s29, %s1127_s30  }
 0x2f1 PF: > { %p1267_p1 = scmp.ge.s32.totalorder %s1376_s14, 2  ;;  %s1153_s28 = sand.u32 1, %s1364_s11  }
 0x2f2   : > { %s1154_s10 = scalar_lea.sflag [#allocation4], %s1153_s28 }
 0x2f3   : > { %p1264_p2 = pnand %p1267_p1, %p1478_p6 }
 0x2f5   : > { %1359 = dma.done.wait (!%p1264_p2), %s1154_s10, 32  }
 0x2f6   : > { %1361 = vsyncadd (!%p1264_p2), %s1154_s10, 4294967264  ;;  %p21_p3 = scmp.ge.s32.totalorder %s1461_s16, 4   ;;  %s1810_s11 = smov %s1368_s12 }
 0x2f7   : > { %s1811_s12 = smov %s1372_s13  ;;  %s1812_s13 = smov %s1472_s19 }
 0x2f8   : > { %s1813_s14 = smov %s1461_s16  ;;  %23 = sbr.rel (!%p21_p3) target bundleno = 6 (0x6), region = 91 }
 0x2ff   :  { %1159 = vsyncpa [#allocation4], 1 }
 0x300   :  { %1161 = vsyncpa [#allocation4 + $0x1], 1 }

</bundles_post_ra>
